<compile_context>
chip_gen: v7x
topology: tpu7x:2x2x1
jax: 0.10.0
libtpu: 0.0.40
codegen_flags: <defaults>
</compile_context>

<pallas_src>
import jax
import jax.numpy as jnp
import numpy as np
from jax.experimental import pallas as pl
from jax.experimental.pallas import tpu as pltpu


def _round_up(x, m):
    return (x + m - 1) // m * m


def _vmem_bytes_estimate(nb, Cin_p, Cmid_p, Cmax_p, P):
    """Rough per-grid-step VMEM footprint in bytes (f32 everywhere)."""
    L = nb * P
    io_blocks = 2 * (Cin_p * L              # x block (double-buffered)
                     + 8 * L                # output block
                     + 9 * Cin_p * L        # conv1 border-mask slab
                     + 9 * Cmid_p * L)      # conv2 border-mask slab
    weights = 2 * (Cmid_p * 9 * Cin_p + Cmid_p
                   + Cmid_p * 9 * Cmid_p + Cmid_p
                   + 8 * Cmid_p + 8)
    scratch = 9 * Cmax_p * L                # shared im2col scratch (single)
    temps = 9 * Cmax_p * L + 2 * Cmid_p * L  # masked patch + h1 + h2
    return 4 * (io_blocks + weights + scratch + temps)


def _pick_batch_block(N, Cin_p, Cmid_p, Cmax_p, P, budget, min_grid_steps):
    """Largest batch block whose per-step footprint fits the VMEM budget.

    min_grid_steps=1 (default): tiny workloads run as a single grid step
    (per-step overhead dominates otherwise).  On v7x (2 TensorCores / chip)
    pass min_grid_steps=2 so the parallel batch grid feeds both cores.
    """
    best = 1
    for nb in range(1, N + 1):
        if N % nb:
            continue
        if N // nb < min_grid_steps:
            continue
        # Lane block must be 128-aligned unless it spans the full lane extent.
        if (nb * P) % 128 != 0 and nb != N:
            continue
        if _vmem_bytes_estimate(nb, Cin_p, Cmid_p, Cmax_p, P) > budget:
            continue
        best = nb
    if (best * P) % 128 != 0 and best != N:
        best = N  # fall back to one full-extent block
    return best


def _make_attention_kernel(W, L, Cin_p, Cmid_p):
    """L = nb * H * W = lane extent of one grid step."""

    def shifted(slab, off):
        # result[:, p] = slab[:, (p + off) mod L] -- one XLU lane rotate.
        # Cross-image / global wrap lanes are zeroed by the border-mask slab.
        s = (-off) % L
        if s == 0:
            return slab
        return pltpu.roll(slab, shift=s, axis=1)

    def kernel(x_ref, m1_ref, m2_ref, w1_ref, b1_ref, w2_ref, b2_ref,
               w3_ref, b3_ref, o_ref, patch_ref):

        def im2col(slab, c_p, mask):
            # Assemble the 9 shifted taps into the shared VMEM scratch, then
            # zero out-of-image taps with ONE fused multiply against the
            # precomputed (9*c_p, L) mask slab (no per-tap broadcasts).
            for k in range(9):
                dy, dx = k // 3, k % 3
                off = (dy - 1) * W + (dx - 1)
                patch_ref[pl.ds(k * c_p, c_p), :] = shifted(slab, off)
            return patch_ref[pl.ds(0, 9 * c_p), :] * mask

        # conv1 (3x3, pad 1) + ReLU: one wide im2col matmul over nb*H*W lanes.
        p1 = im2col(x_ref[...], Cin_p, m1_ref[...])
        h1 = jnp.maximum(
            jnp.dot(w1_ref[...], p1, preferred_element_type=jnp.float32)
            + b1_ref[...], 0.0)                                  # (Cmid_p, L)

        # conv2 (3x3, pad 1) + ReLU (scratch reused).
        p2 = im2col(h1, Cmid_p, m2_ref[...])
        h2 = jnp.maximum(
            jnp.dot(w2_ref[...], p2, preferred_element_type=jnp.float32)
            + b2_ref[...], 0.0)                                  # (Cmid_p, L)

        # conv3 (1x1) + Sigmoid.  Output channels padded 4 -> 8 sublanes so the
        # store is a full-vreg (unmasked) vst; the wrapper drops rows 4..7.
        y = jnp.dot(w3_ref[...], h2, preferred_element_type=jnp.float32) \
            + b3_ref[...]
        o_ref[...] = jax.nn.sigmoid(y).astype(o_ref.dtype)       # (8, L)

    return kernel


def attention_pallas(x_nchw, params, *, min_grid_steps=1,
                     vmem_budget_bytes=24 * 1024 * 1024):
    """SAM.attention_layer forward.  x_nchw: (N, Cin, H, W) f32 -> (N, 4, H, W)."""
    w1, b1, w2, b2, w3, b3 = params   # PyTorch layouts: w (Cout, Cin, kh, kw)
    N, Cin, H, W = x_nchw.shape
    Cmid = w1.shape[0]
    P = H * W
    Cin_p = _round_up(Cin, 8)
    Cmid_p = _round_up(Cmid, 8)
    Cmax_p = max(Cin_p, Cmid_p)
    Cout_p = 8                        # 4 sigmoid channels padded to 8 sublanes

    nb = _pick_batch_block(N, Cin_p, Cmid_p, Cmax_p, P, vmem_budget_bytes,
                           min_grid_steps)
    L = nb * P

    # "CP" layout: channels on sublanes, (batch, pixel) flattened on lanes.
    # Lane-dense loads/stores and batch items stacked into one wide matmul.
    x_cp = jnp.transpose(x_nchw, (1, 0, 2, 3)).reshape(Cin, N * P)
    if Cin_p != Cin:
        x_cp = jnp.pad(x_cp, ((0, Cin_p - Cin), (0, 0)))

    # Conv weights as im2col matrices (Cout_p, 9*C_p), column index = k*C_p + c.
    w1_t = jnp.transpose(w1, (0, 2, 3, 1)).reshape(Cmid, 9, Cin)
    w1_m = (jnp.zeros((Cmid_p, 9, Cin_p), jnp.float32)
            .at[:Cmid, :, :Cin].set(w1_t).reshape(Cmid_p, 9 * Cin_p))
    w2_t = jnp.transpose(w2, (0, 2, 3, 1)).reshape(Cmid, 9, Cmid)
    w2_m = (jnp.zeros((Cmid_p, 9, Cmid_p), jnp.float32)
            .at[:Cmid, :, :Cmid].set(w2_t).reshape(Cmid_p, 9 * Cmid_p))
    w3_m = jnp.zeros((Cout_p, Cmid_p), jnp.float32).at[:4, :Cmid].set(w3[:, :, 0, 0])
    b1_m = jnp.zeros((Cmid_p, 1), jnp.float32).at[:Cmid, 0].set(b1)
    b2_m = jnp.zeros((Cmid_p, 1), jnp.float32).at[:Cmid, 0].set(b2)
    b3_m = jnp.zeros((Cout_p, 1), jnp.float32).at[:4, 0].set(b3)

    # Border-validity mask slabs (9*C_p, nb*P): row k*C_p + c = validity of tap
    # k at each pixel, tiled over the nb batch items stacked along lanes.
    h_idx, w_idx = np.divmod(np.arange(P), W)
    mask9 = np.zeros((9, P), np.float32)
    for k in range(9):
        dy, dx = k // 3, k % 3
        valid = ((h_idx + dy - 1 >= 0) & (h_idx + dy - 1 < H)
                 & (w_idx + dx - 1 >= 0) & (w_idx + dx - 1 < W))
        mask9[k] = valid.astype(np.float32)

    def mask_slab(c_p):
        return jnp.asarray(np.tile(np.repeat(mask9, c_p, axis=0), (1, nb)))

    m1 = mask_slab(Cin_p)      # (9*Cin_p, L)
    m2 = mask_slab(Cmid_p)     # (9*Cmid_p, L)

    kernel = _make_attention_kernel(W, L, Cin_p, Cmid_p)
    vmem_limit = int(min(48 * 1024 * 1024,
                         max(16 * 1024 * 1024,
                             2 * _vmem_bytes_estimate(nb, Cin_p, Cmid_p,
                                                      Cmax_p, P))))

    out_cp = pl.pallas_call(
        kernel,
        out_shape=jax.ShapeDtypeStruct((Cout_p, N * P), jnp.float32),
        grid_spec=pltpu.PrefetchScalarGridSpec(
            num_scalar_prefetch=0,
            grid=(N // nb,),
            in_specs=[
                pl.BlockSpec((Cin_p, L), lambda n: (0, n)),
                # Grid-invariant operands (block index pinned at (0, 0)); they
                # are small here, so double-buffering costs negligible VMEM.
                pl.BlockSpec((9 * Cin_p, L), lambda n: (0, 0)),
                pl.BlockSpec((9 * Cmid_p, L), lambda n: (0, 0)),
                pl.BlockSpec((Cmid_p, 9 * Cin_p), lambda n: (0, 0)),
                pl.BlockSpec((Cmid_p, 1), lambda n: (0, 0)),
                pl.BlockSpec((Cmid_p, 9 * Cmid_p), lambda n: (0, 0)),
                pl.BlockSpec((Cmid_p, 1), lambda n: (0, 0)),
                pl.BlockSpec((Cout_p, Cmid_p), lambda n: (0, 0)),
                pl.BlockSpec((Cout_p, 1), lambda n: (0, 0)),
            ],
            out_specs=pl.BlockSpec((Cout_p, L), lambda n: (0, n)),
            scratch_shapes=[pltpu.VMEM((9 * Cmax_p, L), jnp.float32)],
        ),
        compiler_params=pltpu.CompilerParams(
            dimension_semantics=("parallel",),
            vmem_limit_bytes=vmem_limit,
        ),
    )(x_cp, m1, m2, w1_m, b1_m, w2_m, b2_m, w3_m, b3_m)

    # (Cout_p, N*H*W) -> (N, 4, H, W): drop padded channels, un-stack batch.
    return jnp.transpose(out_cp[:4].reshape(4, N, H, W), (1, 0, 2, 3))


def attention_reference(x_nchw, params):
    """Pure-JAX reference matching torch semantics (for correctness check)."""
    w1, b1, w2, b2, w3, b3 = params

    def conv(x, w, b, pad):
        y = jax.lax.conv_general_dilated(
            x, w, window_strides=(1, 1), padding=[(pad, pad), (pad, pad)],
            dimension_numbers=("NCHW", "OIHW", "NCHW"))
        return y + b[None, :, None, None]

    h = jax.nn.relu(conv(x_nchw, w1, b1, 1))
    h = jax.nn.relu(conv(h, w2, b2, 1))
    return jax.nn.sigmoid(conv(h, w3, b3, 0))


def init_params(key, in_channels):
    """Deterministic synthetic parameters (PyTorch-style shapes)."""
    out_channels = in_channels // 2
    ks = jax.random.split(key, 6)

    def uniform(k, shape, fan_in):
        bound = 1.0 / np.sqrt(fan_in)
        return jax.random.uniform(k, shape, jnp.float32, -bound, bound)

    w1 = uniform(ks[0], (out_channels, in_channels, 3, 3), in_channels * 9)
    b1 = uniform(ks[1], (out_channels,), in_channels * 9)
    w2 = uniform(ks[2], (out_channels, out_channels, 3, 3), out_channels * 9)
    b2 = uniform(ks[3], (out_channels,), out_channels * 9)
    w3 = uniform(ks[4], (4, out_channels, 1, 1), out_channels)
    b3 = uniform(ks[5], (4,), out_channels)
    return (w1, b1, w2, b2, w3, b3)


if __name__ == "__main__":
    key = jax.random.PRNGKey(0)
    k_x, k_p = jax.random.split(key)

    N, C_IN, H, W = 2, 8, 16, 16
    x = jax.random.normal(k_x, (N, C_IN, H, W), jnp.float32)
    params = init_params(k_p, C_IN)

    out = attention_pallas(x, params)
    out = jax.block_until_ready(out)

    ref = jax.block_until_ready(attention_reference(x, params))
    np.testing.assert_allclose(np.asarray(out), np.asarray(ref),
                               rtol=1e-5, atol=1e-5)

    print("KERNEL_OK")
</pallas_src>

<mosaic_0001>
module attributes {stable_mosaic.version = 11 : i64} {
  func.func @kernel(%arg0: i32, %arg1: memref<8x512xf32, #tpu.memory_space<vmem>>, %arg2: memref<72x512xf32, #tpu.memory_space<vmem>>, %arg3: memref<72x512xf32, #tpu.memory_space<vmem>>, %arg4: memref<8x72xf32, #tpu.memory_space<vmem>>, %arg5: memref<8x1xf32, #tpu.memory_space<vmem>>, %arg6: memref<8x72xf32, #tpu.memory_space<vmem>>, %arg7: memref<8x1xf32, #tpu.memory_space<vmem>>, %arg8: memref<8x8xf32, #tpu.memory_space<vmem>>, %arg9: memref<8x1xf32, #tpu.memory_space<vmem>>, %arg10: memref<8x512xf32, #tpu.memory_space<vmem>>, %arg11: memref<72x512xf32, #tpu.memory_space<vmem>>) attributes {dimension_semantics = [#tpu.dimension_semantics<parallel>], iteration_bounds = array<i64: 1>, scalar_prefetch = 0 : i64, scratch_operands = 1 : i64, tpu.core_type = #tpu.core_type<tc>, window_params = [{transform_indices = @transform_0, window_bounds = array<i64: 8, 512>}, {pipeline_mode = #tpu.pipeline_mode<synchronous>, transform_indices = @transform_1, window_bounds = array<i64: 72, 512>}, {pipeline_mode = #tpu.pipeline_mode<synchronous>, transform_indices = @transform_2, window_bounds = array<i64: 72, 512>}, {pipeline_mode = #tpu.pipeline_mode<synchronous>, transform_indices = @transform_3, window_bounds = array<i64: 8, 72>}, {pipeline_mode = #tpu.pipeline_mode<synchronous>, transform_indices = @transform_4, window_bounds = array<i64: 8, 1>}, {pipeline_mode = #tpu.pipeline_mode<synchronous>, transform_indices = @transform_5, window_bounds = array<i64: 8, 72>}, {pipeline_mode = #tpu.pipeline_mode<synchronous>, transform_indices = @transform_6, window_bounds = array<i64: 8, 1>}, {pipeline_mode = #tpu.pipeline_mode<synchronous>, transform_indices = @transform_7, window_bounds = array<i64: 8, 8>}, {pipeline_mode = #tpu.pipeline_mode<synchronous>, transform_indices = @transform_8, window_bounds = array<i64: 8, 1>}, {transform_indices = @transform_9, window_bounds = array<i64: 8, 512>}]} {
    %c0 = arith.constant 0 : index
    %c0_0 = arith.constant 0 : index
    %0 = vector.load %arg1[%c0, %c0_0] : memref<8x512xf32, #tpu.memory_space<vmem>>, vector<8x512xf32>
    %c0_1 = arith.constant 0 : index
    %c0_2 = arith.constant 0 : index
    %1 = vector.load %arg2[%c0_1, %c0_2] : memref<72x512xf32, #tpu.memory_space<vmem>>, vector<72x512xf32>
    %c17_i32 = arith.constant 17 : i32
    %2 = tpu.dynamic_rotate %0 by %c17_i32 dim 1 : vector<8x512xf32>, i32 -> vector<8x512xf32>
    %c0_3 = arith.constant 0 : index
    %c0_4 = arith.constant 0 : index
    %3 = vector.load %arg11[%c0_3, %c0_4] : memref<72x512xf32, #tpu.memory_space<vmem>>, vector<8x512xf32>
    tpu.vector_store %arg11[%c0_3, %c0_4], %2 {strides = array<i32>} : memref<72x512xf32, #tpu.memory_space<vmem>>, vector<8x512xf32>,
    %c16_i32 = arith.constant 16 : i32
    %4 = tpu.dynamic_rotate %0 by %c16_i32 dim 1 : vector<8x512xf32>, i32 -> vector<8x512xf32>
    %c8 = arith.constant 8 : index
    %c0_5 = arith.constant 0 : index
    %5 = vector.load %arg11[%c8, %c0_5] : memref<72x512xf32, #tpu.memory_space<vmem>>, vector<8x512xf32>
    tpu.vector_store %arg11[%c8, %c0_5], %4 {strides = array<i32>} : memref<72x512xf32, #tpu.memory_space<vmem>>, vector<8x512xf32>,
    %c15_i32 = arith.constant 15 : i32
    %6 = tpu.dynamic_rotate %0 by %c15_i32 dim 1 : vector<8x512xf32>, i32 -> vector<8x512xf32>
    %c16 = arith.constant 16 : index
    %c0_6 = arith.constant 0 : index
    %7 = vector.load %arg11[%c16, %c0_6] : memref<72x512xf32, #tpu.memory_space<vmem>>, vector<8x512xf32>
    tpu.vector_store %arg11[%c16, %c0_6], %6 {strides = array<i32>} : memref<72x512xf32, #tpu.memory_space<vmem>>, vector<8x512xf32>,
    %c1_i32 = arith.constant 1 : i32
    %8 = tpu.dynamic_rotate %0 by %c1_i32 dim 1 : vector<8x512xf32>, i32 -> vector<8x512xf32>
    %c24 = arith.constant 24 : index
    %c0_7 = arith.constant 0 : index
    %9 = vector.load %arg11[%c24, %c0_7] : memref<72x512xf32, #tpu.memory_space<vmem>>, vector<8x512xf32>
    tpu.vector_store %arg11[%c24, %c0_7], %8 {strides = array<i32>} : memref<72x512xf32, #tpu.memory_space<vmem>>, vector<8x512xf32>,
    %c32 = arith.constant 32 : index
    %c0_8 = arith.constant 0 : index
    %10 = vector.load %arg11[%c32, %c0_8] : memref<72x512xf32, #tpu.memory_space<vmem>>, vector<8x512xf32>
    tpu.vector_store %arg11[%c32, %c0_8], %0 {strides = array<i32>} : memref<72x512xf32, #tpu.memory_space<vmem>>, vector<8x512xf32>,
    %c511_i32 = arith.constant 511 : i32
    %11 = tpu.dynamic_rotate %0 by %c511_i32 dim 1 : vector<8x512xf32>, i32 -> vector<8x512xf32>
    %c40 = arith.constant 40 : index
    %c0_9 = arith.constant 0 : index
    %12 = vector.load %arg11[%c40, %c0_9] : memref<72x512xf32, #tpu.memory_space<vmem>>, vector<8x512xf32>
    tpu.vector_store %arg11[%c40, %c0_9], %11 {strides = array<i32>} : memref<72x512xf32, #tpu.memory_space<vmem>>, vector<8x512xf32>,
    %c497_i32 = arith.constant 497 : i32
    %13 = tpu.dynamic_rotate %0 by %c497_i32 dim 1 : vector<8x512xf32>, i32 -> vector<8x512xf32>
    %c48 = arith.constant 48 : index
    %c0_10 = arith.constant 0 : index
    %14 = vector.load %arg11[%c48, %c0_10] : memref<72x512xf32, #tpu.memory_space<vmem>>, vector<8x512xf32>
    tpu.vector_store %arg11[%c48, %c0_10], %13 {strides = array<i32>} : memref<72x512xf32, #tpu.memory_space<vmem>>, vector<8x512xf32>,
    %c496_i32 = arith.constant 496 : i32
    %15 = tpu.dynamic_rotate %0 by %c496_i32 dim 1 : vector<8x512xf32>, i32 -> vector<8x512xf32>
    %c56 = arith.constant 56 : index
    %c0_11 = arith.constant 0 : index
    %16 = vector.load %arg11[%c56, %c0_11] : memref<72x512xf32, #tpu.memory_space<vmem>>, vector<8x512xf32>
    tpu.vector_store %arg11[%c56, %c0_11], %15 {strides = array<i32>} : memref<72x512xf32, #tpu.memory_space<vmem>>, vector<8x512xf32>,
    %c495_i32 = arith.constant 495 : i32
    %17 = tpu.dynamic_rotate %0 by %c495_i32 dim 1 : vector<8x512xf32>, i32 -> vector<8x512xf32>
    %c64 = arith.constant 64 : index
    %c0_12 = arith.constant 0 : index
    %18 = vector.load %arg11[%c64, %c0_12] : memref<72x512xf32, #tpu.memory_space<vmem>>, vector<8x512xf32>
    tpu.vector_store %arg11[%c64, %c0_12], %17 {strides = array<i32>} : memref<72x512xf32, #tpu.memory_space<vmem>>, vector<8x512xf32>,
    %c0_13 = arith.constant 0 : index
    %c0_14 = arith.constant 0 : index
    %19 = vector.load %arg11[%c0_13, %c0_14] : memref<72x512xf32, #tpu.memory_space<vmem>>, vector<72x512xf32>
    %20 = arith.mulf %19, %1 : vector<72x512xf32>
    %c0_15 = arith.constant 0 : index
    %c0_16 = arith.constant 0 : index
    %21 = vector.load %arg4[%c0_15, %c0_16] : memref<8x72xf32, #tpu.memory_space<vmem>>, vector<8x72xf32>
    %cst = arith.constant dense<0.000000e+00> : vector<8x512xf32>
    %22 = tpu.matmul %21, %20, %cst {dimension_numbers = #tpu.dot_dimension_numbers<[1], [0], [0], [1], [0, 0, 1, 1], [], []>} : vector<8x72xf32>, vector<72x512xf32>, vector<8x512xf32> -> vector<8x512xf32>
    %c0_17 = arith.constant 0 : index
    %c0_18 = arith.constant 0 : index
    %23 = vector.load %arg5[%c0_17, %c0_18] : memref<8x1xf32, #tpu.memory_space<vmem>>, vector<8x1xf32>
    %24 = vector.broadcast %23 : vector<8x1xf32> to vector<8x512xf32>
    %25 = arith.addf %22, %24 : vector<8x512xf32>
    %cst_19 = arith.constant 0.000000e+00 : f32
    %26 = vector.broadcast %cst_19 : f32 to vector<8x512xf32>
    %27 = arith.maximumf %25, %26 : vector<8x512xf32>
    %c0_20 = arith.constant 0 : index
    %c0_21 = arith.constant 0 : index
    %28 = vector.load %arg3[%c0_20, %c0_21] : memref<72x512xf32, #tpu.memory_space<vmem>>, vector<72x512xf32>
    %c17_i32_22 = arith.constant 17 : i32
    %29 = tpu.dynamic_rotate %27 by %c17_i32_22 dim 1 : vector<8x512xf32>, i32 -> vector<8x512xf32>
    %c0_23 = arith.constant 0 : index
    %c0_24 = arith.constant 0 : index
    %30 = vector.load %arg11[%c0_23, %c0_24] : memref<72x512xf32, #tpu.memory_space<vmem>>, vector<8x512xf32>
    tpu.vector_store %arg11[%c0_23, %c0_24], %29 {strides = array<i32>} : memref<72x512xf32, #tpu.memory_space<vmem>>, vector<8x512xf32>,
    %c16_i32_25 = arith.constant 16 : i32
    %31 = tpu.dynamic_rotate %27 by %c16_i32_25 dim 1 : vector<8x512xf32>, i32 -> vector<8x512xf32>
    %c8_26 = arith.constant 8 : index
    %c0_27 = arith.constant 0 : index
    %32 = vector.load %arg11[%c8_26, %c0_27] : memref<72x512xf32, #tpu.memory_space<vmem>>, vector<8x512xf32>
    tpu.vector_store %arg11[%c8_26, %c0_27], %31 {strides = array<i32>} : memref<72x512xf32, #tpu.memory_space<vmem>>, vector<8x512xf32>,
    %c15_i32_28 = arith.constant 15 : i32
    %33 = tpu.dynamic_rotate %27 by %c15_i32_28 dim 1 : vector<8x512xf32>, i32 -> vector<8x512xf32>
    %c16_29 = arith.constant 16 : index
    %c0_30 = arith.constant 0 : index
    %34 = vector.load %arg11[%c16_29, %c0_30] : memref<72x512xf32, #tpu.memory_space<vmem>>, vector<8x512xf32>
    tpu.vector_store %arg11[%c16_29, %c0_30], %33 {strides = array<i32>} : memref<72x512xf32, #tpu.memory_space<vmem>>, vector<8x512xf32>,
    %c1_i32_31 = arith.constant 1 : i32
    %35 = tpu.dynamic_rotate %27 by %c1_i32_31 dim 1 : vector<8x512xf32>, i32 -> vector<8x512xf32>
    %c24_32 = arith.constant 24 : index
    %c0_33 = arith.constant 0 : index
    %36 = vector.load %arg11[%c24_32, %c0_33] : memref<72x512xf32, #tpu.memory_space<vmem>>, vector<8x512xf32>
    tpu.vector_store %arg11[%c24_32, %c0_33], %35 {strides = array<i32>} : memref<72x512xf32, #tpu.memory_space<vmem>>, vector<8x512xf32>,
    %c32_34 = arith.constant 32 : index
    %c0_35 = arith.constant 0 : index
    %37 = vector.load %arg11[%c32_34, %c0_35] : memref<72x512xf32, #tpu.memory_space<vmem>>, vector<8x512xf32>
    tpu.vector_store %arg11[%c32_34, %c0_35], %27 {strides = array<i32>} : memref<72x512xf32, #tpu.memory_space<vmem>>, vector<8x512xf32>,
    %c511_i32_36 = arith.constant 511 : i32
    %38 = tpu.dynamic_rotate %27 by %c511_i32_36 dim 1 : vector<8x512xf32>, i32 -> vector<8x512xf32>
    %c40_37 = arith.constant 40 : index
    %c0_38 = arith.constant 0 : index
    %39 = vector.load %arg11[%c40_37, %c0_38] : memref<72x512xf32, #tpu.memory_space<vmem>>, vector<8x512xf32>
    tpu.vector_store %arg11[%c40_37, %c0_38], %38 {strides = array<i32>} : memref<72x512xf32, #tpu.memory_space<vmem>>, vector<8x512xf32>,
    %c497_i32_39 = arith.constant 497 : i32
    %40 = tpu.dynamic_rotate %27 by %c497_i32_39 dim 1 : vector<8x512xf32>, i32 -> vector<8x512xf32>
    %c48_40 = arith.constant 48 : index
    %c0_41 = arith.constant 0 : index
    %41 = vector.load %arg11[%c48_40, %c0_41] : memref<72x512xf32, #tpu.memory_space<vmem>>, vector<8x512xf32>
    tpu.vector_store %arg11[%c48_40, %c0_41], %40 {strides = array<i32>} : memref<72x512xf32, #tpu.memory_space<vmem>>, vector<8x512xf32>,
    %c496_i32_42 = arith.constant 496 : i32
    %42 = tpu.dynamic_rotate %27 by %c496_i32_42 dim 1 : vector<8x512xf32>, i32 -> vector<8x512xf32>
    %c56_43 = arith.constant 56 : index
    %c0_44 = arith.constant 0 : index
    %43 = vector.load %arg11[%c56_43, %c0_44] : memref<72x512xf32, #tpu.memory_space<vmem>>, vector<8x512xf32>
    tpu.vector_store %arg11[%c56_43, %c0_44], %42 {strides = array<i32>} : memref<72x512xf32, #tpu.memory_space<vmem>>, vector<8x512xf32>,
    %c495_i32_45 = arith.constant 495 : i32
    %44 = tpu.dynamic_rotate %27 by %c495_i32_45 dim 1 : vector<8x512xf32>, i32 -> vector<8x512xf32>
    %c64_46 = arith.constant 64 : index
    %c0_47 = arith.constant 0 : index
    %45 = vector.load %arg11[%c64_46, %c0_47] : memref<72x512xf32, #tpu.memory_space<vmem>>, vector<8x512xf32>
    tpu.vector_store %arg11[%c64_46, %c0_47], %44 {strides = array<i32>} : memref<72x512xf32, #tpu.memory_space<vmem>>, vector<8x512xf32>,
    %c0_48 = arith.constant 0 : index
    %c0_49 = arith.constant 0 : index
    %46 = vector.load %arg11[%c0_48, %c0_49] : memref<72x512xf32, #tpu.memory_space<vmem>>, vector<72x512xf32>
    %47 = arith.mulf %46, %28 : vector<72x512xf32>
    %c0_50 = arith.constant 0 : index
    %c0_51 = arith.constant 0 : index
    %48 = vector.load %arg6[%c0_50, %c0_51] : memref<8x72xf32, #tpu.memory_space<vmem>>, vector<8x72xf32>
    %cst_52 = arith.constant dense<0.000000e+00> : vector<8x512xf32>
    %49 = tpu.matmul %48, %47, %cst_52 {dimension_numbers = #tpu.dot_dimension_numbers<[1], [0], [0], [1], [0, 0, 1, 1], [], []>} : vector<8x72xf32>, vector<72x512xf32>, vector<8x512xf32> -> vector<8x512xf32>
    %c0_53 = arith.constant 0 : index
    %c0_54 = arith.constant 0 : index
    %50 = vector.load %arg7[%c0_53, %c0_54] : memref<8x1xf32, #tpu.memory_space<vmem>>, vector<8x1xf32>
    %51 = vector.broadcast %50 : vector<8x1xf32> to vector<8x512xf32>
    %52 = arith.addf %49, %51 : vector<8x512xf32>
    %cst_55 = arith.constant 0.000000e+00 : f32
    %53 = vector.broadcast %cst_55 : f32 to vector<8x512xf32>
    %54 = arith.maximumf %52, %53 : vector<8x512xf32>
    %c0_56 = arith.constant 0 : index
    %c0_57 = arith.constant 0 : index
    %55 = vector.load %arg8[%c0_56, %c0_57] : memref<8x8xf32, #tpu.memory_space<vmem>>, vector<8x8xf32>
    %cst_58 = arith.constant dense<0.000000e+00> : vector<8x512xf32>
    %56 = tpu.matmul %55, %54, %cst_58 {dimension_numbers = #tpu.dot_dimension_numbers<[1], [0], [0], [1], [0, 0, 1, 1], [], []>} : vector<8x8xf32>, vector<8x512xf32>, vector<8x512xf32> -> vector<8x512xf32>
    %c0_59 = arith.constant 0 : index
    %c0_60 = arith.constant 0 : index
    %57 = vector.load %arg9[%c0_59, %c0_60] : memref<8x1xf32, #tpu.memory_space<vmem>>, vector<8x1xf32>
    %58 = vector.broadcast %57 : vector<8x1xf32> to vector<8x512xf32>
    %59 = arith.addf %56, %58 : vector<8x512xf32>
    %60 = arith.negf %59 : vector<8x512xf32>
    %61 = math.exp %60 : vector<8x512xf32>
    %cst_61 = arith.constant 1.000000e+00 : f32
    %62 = vector.broadcast %cst_61 : f32 to vector<8x512xf32>
    %63 = arith.addf %62, %61 : vector<8x512xf32>
    %64 = arith.divf %62, %63 : vector<8x512xf32>
    %c0_62 = arith.constant 0 : index
    %c0_63 = arith.constant 0 : index
    %65 = vector.load %arg10[%c0_62, %c0_63] : memref<8x512xf32, #tpu.memory_space<vmem>>, vector<8x512xf32>
    tpu.vector_store %arg10[%c0_62, %c0_63], %64 {strides = array<i32>} : memref<8x512xf32, #tpu.memory_space<vmem>>, vector<8x512xf32>,
    return
  }
  func.func @transform_0(%arg0: i32) -> (i32, i32) {
    %c0_i32 = arith.constant 0 : i32
    %c0_i32_0 = arith.constant 0 : i32
    return %c0_i32, %arg0 : i32, i32
  }
  func.func @transform_1(%arg0: i32) -> (i32, i32) {
    %c0_i32 = arith.constant 0 : i32
    %c0_i32_0 = arith.constant 0 : i32
    %c0_i32_1 = arith.constant 0 : i32
    return %c0_i32, %c0_i32_0 : i32, i32
  }
  func.func @transform_2(%arg0: i32) -> (i32, i32) {
    %c0_i32 = arith.constant 0 : i32
    %c0_i32_0 = arith.constant 0 : i32
    %c0_i32_1 = arith.constant 0 : i32
    return %c0_i32, %c0_i32_0 : i32, i32
  }
  func.func @transform_3(%arg0: i32) -> (i32, i32) {
    %c0_i32 = arith.constant 0 : i32
    %c0_i32_0 = arith.constant 0 : i32
    %c0_i32_1 = arith.constant 0 : i32
    return %c0_i32, %c0_i32_0 : i32, i32
  }
  func.func @transform_4(%arg0: i32) -> (i32, i32) {
    %c0_i32 = arith.constant 0 : i32
    %c0_i32_0 = arith.constant 0 : i32
    %c0_i32_1 = arith.constant 0 : i32
    return %c0_i32, %c0_i32_0 : i32, i32
  }
  func.func @transform_5(%arg0: i32) -> (i32, i32) {
    %c0_i32 = arith.constant 0 : i32
    %c0_i32_0 = arith.constant 0 : i32
    %c0_i32_1 = arith.constant 0 : i32
    return %c0_i32, %c0_i32_0 : i32, i32
  }
  func.func @transform_6(%arg0: i32) -> (i32, i32) {
    %c0_i32 = arith.constant 0 : i32
    %c0_i32_0 = arith.constant 0 : i32
    %c0_i32_1 = arith.constant 0 : i32
    return %c0_i32, %c0_i32_0 : i32, i32
  }
  func.func @transform_7(%arg0: i32) -> (i32, i32) {
    %c0_i32 = arith.constant 0 : i32
    %c0_i32_0 = arith.constant 0 : i32
    %c0_i32_1 = arith.constant 0 : i32
    return %c0_i32, %c0_i32_0 : i32, i32
  }
  func.func @transform_8(%arg0: i32) -> (i32, i32) {
    %c0_i32 = arith.constant 0 : i32
    %c0_i32_0 = arith.constant 0 : i32
    %c0_i32_1 = arith.constant 0 : i32
    return %c0_i32, %c0_i32_0 : i32, i32
  }
  func.func @transform_9(%arg0: i32) -> (i32, i32) {
    %c0_i32 = arith.constant 0 : i32
    %c0_i32_0 = arith.constant 0 : i32
    return %c0_i32, %arg0 : i32, i32
  }
}

</mosaic_0001>

<bundles_post_ra>
// kernel: tpu_custom_call.1
= control target key start
LH: loop header
LB: loop body
LE: loop exit
PB: predicated region body
PF: predicated region fallthrough
CT: control target
= control target key end

     0   :  { %14 = vsyncpa [#allocation4], 0  ;;  %s1716_s0 = inlined_call_operand.hbm [shape: f32[8,512], index: 0, kind: input, shape index: {}]   ;;  %s1717_s1 = inlined_call_operand.hbm [shape: f32[72,512], index: 1, kind: input, shape index: {}]   ;;  %s1718_s2 = inlined_call_operand.hbm [shape: f32[72,512], index: 2, kind: input, shape index: {}]   ;;  %s1719_s3 = inlined_call_operand.vmem [shape: f32[8,72], index: 3, kind: input, shape index: {}]   ;;  %s1720_s4 = inlined_call_operand.vmem [shape: f32[8,1], index: 4, kind: input, shape index: {}]   ;;  %s1721_s5 = inlined_call_operand.vmem [shape: f32[8,72], index: 5, kind: input, shape index: {}]   ;;  %s1722_s6 = inlined_call_operand.vmem [shape: f32[8,1], index: 6, kind: input, shape index: {}]   ;;  %s1723_s7 = inlined_call_operand.vmem [shape: f32[8,8], index: 7, kind: input, shape index: {}]   ;;  %s1724_s8 = inlined_call_operand.vmem [shape: f32[8,1], index: 8, kind: input, shape index: {}]   ;;  %s1725_s9 = inlined_call_operand.hbm [shape: f32[8,512], index: 9, kind: output, shape index: {}]  }
   0x1   :  { %15 = vsyncpa [#allocation7], 0 }
   0x2   :  { %16 = vsyncpa [#allocation5], 0  ;;  %s1278_s30 = smov [#allocation6]   ;;  %s1184_s13 = scalar_lea.hbm %s1717_s1, 4608 }
   0x3   :  { %s32_s10 = sshll.u32 %s1278_s30, 4  ;;  %p1185_p0 = scmp.ne.s32.totalorder %s1717_s1, %s1184_s13  ;;  %s33_s10 = int_to_ptr.vmem [resolvable:$true] %s32_s10 }
   0x4   :  { %p1188_p1 = scmp.lt.u32.totalorder %s1184_s13, %s1717_s1 }
   0x6   :  { %p1190_p2 = pnand %p1188_p1, %p1185_p0 }
   0x8   :  { %1193 = shalt.err (!%p1190_p2)
}
   0x9   :  { %s1194_s18 = scalar_lea.vmem %s33_s10, 4608  ;;  %p1199_p4 = scmp.lt.s32.totalorder %s33_s10, %s33_s10 }
   0xa   :  { %p1195_p3 = scmp.ne.s32.totalorder %s33_s10, %s1194_s18  ;;  %p1200_p5 = scmp.lt.s32.totalorder %s1194_s18, %s1194_s18 }
   0xc   :  { %p1201_p6 = por %p1200_p5, %p1199_p4 }
   0xe   :  { %p1202_p7 = pnand %p1201_p6, %p1195_p3 }
  0x10   :  { %1205 = shalt.err (!%p1202_p7)
}
  0x11   :  { %s1279_s19 = smov 512   ;;  %s1280_s20 = smov 32  }
  0x12   :  { %38 = dma.hbm_to_vmem [thread:$0]  %s1717_s1, 4608, %s33_s10, [#allocation7], %s1279_s19, %s1279_s19, %s1280_s20  }
  0x13   :  { %s1281_s23 = smov [#allocation3]   ;;  %s1282_s25 = smov [#allocation8]  }
  0x14   :  { %s23_s24 = sshll.u32 %s1281_s23, 4  ;;  %s44_s26 = sshll.u32 %s1282_s25, 4  ;;  %s24_s24 = int_to_ptr.vmem [resolvable:$true] %s23_s24  ;;  %s45_s26 = int_to_ptr.vmem [resolvable:$true] %s44_s26 }
  0x15   :  { %s1206_s29 = scalar_lea.hbm %s1716_s0, 512 }
  0x16   :  { %p1207_p8 = scmp.ne.s32.totalorder %s1716_s0, %s1206_s29  ;;  %p1210_p9 = scmp.lt.u32.totalorder %s1206_s29, %s1716_s0 }
  0x18   :  { %p1212_p10 = pnand %p1210_p9, %p1207_p8 }
  0x1a   :  { %1215 = shalt.err (!%p1212_p10)
}
  0x1b   :  { %s1216_s1 = scalar_lea.vmem %s24_s24, 512  ;;  %p1221_p12 = scmp.lt.s32.totalorder %s24_s24, %s24_s24 }
  0x1c   :  { %p1217_p11 = scmp.ne.s32.totalorder %s24_s24, %s1216_s1  ;;  %p1222_p13 = scmp.lt.s32.totalorder %s1216_s1, %s1216_s1 }
  0x1e   :  { %p1223_p0 = por %p1222_p13, %p1221_p12 }
  0x20   :  { %p1224_p1 = pnand %p1223_p0, %p1217_p11 }
  0x22   :  { %1227 = shalt.err (!%p1224_p1)
}
  0x23   :  { %26 = dma.hbm_to_vmem [thread:$0]  %s1716_s0, 512, %s24_s24, [#allocation4]  }
  0x24   :  { %s1228_s17 = scalar_lea.hbm %s1718_s2, 4608 }
  0x25   :  { %p1229_p2 = scmp.ne.s32.totalorder %s1718_s2, %s1228_s17  ;;  %p1232_p3 = scmp.lt.u32.totalorder %s1228_s17, %s1718_s2 }
  0x27   :  { %p1234_p4 = pnand %p1232_p3, %p1229_p2 }
  0x29   :  { %1237 = shalt.err (!%p1234_p4)
}
  0x2a   :  { %s1238_s25 = scalar_lea.vmem %s45_s26, 4608  ;;  %p1243_p6 = scmp.lt.s32.totalorder %s45_s26, %s45_s26 }
  0x2b   :  { %p1239_p5 = scmp.ne.s32.totalorder %s45_s26, %s1238_s25  ;;  %p1244_p7 = scmp.lt.s32.totalorder %s1238_s25, %s1238_s25 }
  0x2d   :  { %p1245_p8 = por %p1244_p7, %p1243_p6 }
  0x2f   :  { %p1246_p9 = pnand %p1245_p8, %p1239_p5 }
  0x31   :  { %1249 = shalt.err (!%p1246_p9)
}
  0x32   :  { %50 = dma.hbm_to_vmem [thread:$0]  %s1718_s2, 4608, %s45_s26, [#allocation7], %s1279_s19, %s1279_s19, %s1280_s20  }
  0x33   :  { %1272 = dma.done.wait [#allocation4], 512  }
  0x34   :  { %1273 = vsyncadd [#allocation4], 4294966784 }
  0x35   :  { %1274 = dma.done.wait [#allocation7], 9216  }
  0x36   :  { %1275 = vsyncadd [#allocation7], 4294958080  ;;  %v1386_v0 = vld [vmem:[#allocation3 + $0x10] sm:$0xff]  ;;  %v1388_v1 = vld [vmem:[#allocation3] sm:$0xff]  ;;  %s1283_s27 = smov 17   ;;  %s1284_s2 = smov 16   ;;  %v120_v7 = vlaneseq }
  0x37   :  { %116 = vrot.lane.b32.xlu1 %v1386_v0, %s1283_s27  ;;  %112 = vrot.lane.b32.xlu0 %v1388_v1, %s1283_s27  ;;  %v1394_v2 = vld [vmem:[#allocation3 + $0x18] sm:$0xff]  ;;  %v1396_v3 = vld [vmem:[#allocation3 + $0x8] sm:$0xff]  ;;  %s1285_s19 = smov 15   ;;  %s1286_s20 = smov 1   ;;  %v1290_v4 = vmov 0.0   ;;  %v1291_v5 = vmov 0  }
  0x38   :  { %s1287_s26 = smov 127   ;;  %s1288_s28 = smov 113   ;;  %401 = vmatprep.mubr.f32.mxu0 %v1290_v4  ;;  %472 = vmatprep.mubr.f32.mxu1 %v1290_v4  ;;  %v327_v6 = vld [vmem:[%s1720_s4] sm:$0xff]  ;;  %v1463_v10 = vand.u32 127, %v120_v7  ;;  %v77_v14 = vld [vmem:[#allocation6 + $0x8] sm:$0xff]  ;;  %v78_v21 = vld [vmem:[#allocation6 + $0x10] sm:$0xff] }
  0x39   :  { %s1289_s29 = smov 112   ;;  %1166 = vset.pattern.permute.xlu0 %v1291_v5  ;;  %1167 = vset.pattern.permute.xlu1 %v1291_v5  ;;  %s1292_s30 = smov 111   ;;  %v81_v15 = vld [vmem:[#allocation6 + $0x28] sm:$0xff]  ;;  %v76_v18 = vld [vmem:[#allocation6] sm:$0xff]  ;;  %v82_v27 = vld [vmem:[#allocation6 + $0x30] sm:$0xff]  ;;  %vm333_vm8 = vcmask 588800  }
  0x3a   :  { %vm122_vm0 = vcmp.lt.s32.totalorder %v1463_v10, 17  ;;  %vm139_vm1 = vcmp.lt.s32.totalorder %v1463_v10, 16  ;;  %v80_v23 = vld [vmem:[#allocation6 + $0x20] sm:$0xff]  ;;  %v79_v28 = vld [vmem:[#allocation6 + $0x18] sm:$0xff]  ;;  %vm156_vm2 = vcmp.lt.s32.totalorder %v1463_v10, 15  ;;  %vm173_vm3 = vcmp.lt.s32.totalorder %v1463_v10, 1 }
  0x3b   :  { %118 = vrot.lane.b32.xlu1 %v1394_v2, %s1283_s27  ;;  %114 = vrot.lane.b32.xlu0 %v1396_v3, %s1283_s27  ;;  %v83_v29 = vld [vmem:[#allocation6 + $0x38] sm:$0xff]  ;;  %v85_v49 = vld [vmem:[#allocation6 + $0x48] sm:$0xff]  ;;  %v84_v54 = vld [vmem:[#allocation6 + $0x40] sm:$0xff]  ;;  %vm194_vm4 = vcmp.lt.s32.totalorder %v1463_v10, 127  ;;  %vm228_vm5 = vcmp.lt.s32.totalorder %v1463_v10, 112  ;;  %vm211_vm6 = vcmp.lt.s32.totalorder %v1463_v10, 113 }
  0x3c   :  { %v89_v51 = vld [vmem:[#allocation6 + $0x68] sm:$0xff]  ;;  %v86_v58 = vld [vmem:[#allocation6 + $0x50] sm:$0xff]  ;;  %v87_v59 = vld [vmem:[#allocation6 + $0x58] sm:$0xff]  ;;  %vm245_vm7 = vcmp.lt.s32.totalorder %v1463_v10, 111  ;;  %vm886_vm9 = vcmask 64512  }
  0x3d   :  { %v88_v63 = vld [vmem:[#allocation6 + $0x60] sm:$0xff]  ;;  %v90_v5 = vld [vmem:[#allocation6 + $0x70] sm:$0xff] }
  0x3f   :  { %133 = vrot.lane.b32.xlu1 %v1396_v3, %s1284_s2  ;;  %131 = vrot.lane.b32.xlu0 %v1388_v1, %s1284_s2 }
  0x43   :  { %137 = vrot.lane.b32.xlu1 %v1394_v2, %s1284_s2  ;;  %135 = vrot.lane.b32.xlu0 %v1386_v0, %s1284_s2 }
  0x47   :  { %150 = vrot.lane.b32.xlu1 %v1396_v3, %s1285_s19  ;;  %148 = vrot.lane.b32.xlu0 %v1388_v1, %s1285_s19 }
  0x4b   :  { %154 = vrot.lane.b32.xlu1 %v1394_v2, %s1285_s19  ;;  %152 = vrot.lane.b32.xlu0 %v1386_v0, %s1285_s19 }
  0x4f   :  { %167 = vrot.lane.b32.xlu1 %v1396_v3, %s1286_s20  ;;  %165 = vrot.lane.b32.xlu0 %v1388_v1, %s1286_s20 }
  0x53   :  { %171 = vrot.lane.b32.xlu1 %v1394_v2, %s1286_s20  ;;  %169 = vrot.lane.b32.xlu0 %v1386_v0, %s1286_s20 }
  0x57   :  { %188 = vrot.lane.b32.xlu1 %v1396_v3, %s1287_s26  ;;  %186 = vrot.lane.b32.xlu0 %v1388_v1, %s1287_s26 }
  0x5b   :  { %192 = vrot.lane.b32.xlu1 %v1394_v2, %s1287_s26  ;;  %190 = vrot.lane.b32.xlu0 %v1386_v0, %s1287_s26 }
  0x5f   :  { %205 = vrot.lane.b32.xlu1 %v1396_v3, %s1288_s28  ;;  %203 = vrot.lane.b32.xlu0 %v1388_v1, %s1288_s28 }
  0x63   :  { %209 = vrot.lane.b32.xlu1 %v1394_v2, %s1288_s28  ;;  %207 = vrot.lane.b32.xlu0 %v1386_v0, %s1288_s28 }
  0x67   :  { %222 = vrot.lane.b32.xlu1 %v1396_v3, %s1289_s29  ;;  %220 = vrot.lane.b32.xlu0 %v1388_v1, %s1289_s29 }
  0x6b   :  { %226 = vrot.lane.b32.xlu1 %v1394_v2, %s1289_s29  ;;  %224 = vrot.lane.b32.xlu0 %v1386_v0, %s1289_s29 }
  0x6f   :  { %239 = vrot.lane.b32.xlu1 %v1396_v3, %s1292_s30  ;;  %237 = vrot.lane.b32.xlu0 %v1388_v1, %s1292_s30 }
  0x73   :  { %243 = vrot.lane.b32.xlu1 %v1394_v2, %s1292_s30  ;;  %241 = vrot.lane.b32.xlu0 %v1386_v0, %s1292_s30 }
  0x77   :  { %330 = vperm.xlu0 %1166, %v327_v6   ;;  %v91_v6 = vld [vmem:[#allocation6 + $0x78] sm:$0xff] }
  0xa9   :  { %v117_v8 = vpop.permute.xlu1 %116  ;;  %v113_v9 = vpop.permute.xlu0 %112 }
  0xad   :  { %v119_v11 = vpop.permute.xlu1 %118  ;;  %v115_v12 = vpop.permute.xlu0 %114 }
  0xae   :  { %v125_v13 = vsel %vm122_vm0, %v113_v9, %v115_v12  ;;  %v126_v19 = vsel %vm122_vm0, %v119_v11, %v113_v9  ;;  %v124_v22 = vsel %vm122_vm0, %v115_v12, %v117_v8  ;;  %v123_v26 = vsel %vm122_vm0, %v117_v8, %v119_v11 }
  0xaf   :  { %v291_v24 = vmul.f32 %v125_v13, %v77_v14  ;;  %v290_v30 = vmul.f32 %v126_v19, %v76_v18  ;;  %v292_v34 = vmul.f32 %v124_v22, %v78_v21  ;;  %v293_v40 = vmul.f32 %v123_v26, %v79_v28  ;;  %v93_v26 = vld [vmem:[#allocation6 + $0x88] sm:$0xff]  ;;  %v94_v28 = vld [vmem:[#allocation6 + $0x90] sm:$0xff] }
  0xb1   :  { %v134_v16 = vpop.permute.xlu1 %133  ;;  %v132_v17 = vpop.permute.xlu0 %131 }
  0xb2   :  { %v142_v20 = vsel %vm139_vm1, %v132_v17, %v134_v16 }
  0xb3   :  { %v295_v25 = vmul.f32 %v142_v20, %v81_v15 }
  0xb5   :  { %v138_v31 = vpop.permute.xlu1 %137  ;;  %v136_v32 = vpop.permute.xlu0 %135  ;;  %v1086_v33 = vpack.c.bf16 %v295_v25, %v291_v24  ;;  %v92_v25 = vld [vmem:[#allocation6 + $0x80] sm:$0xff] }
  0xb6   :  { %v143_v35 = vsel %vm139_vm1, %v138_v31, %v132_v17  ;;  %v140_v36 = vsel %vm139_vm1, %v136_v32, %v138_v31  ;;  %v141_v37 = vsel %vm139_vm1, %v134_v16, %v136_v32  ;;  %v99_v31 = vld [vmem:[#allocation6 + $0xb8] sm:$0xff]  ;;  %v97_v32 = vld [vmem:[#allocation6 + $0xa8] sm:$0xff] }
  0xb7   :  { %v294_v38 = vmul.f32 %v143_v35, %v80_v23  ;;  %v296_v39 = vmul.f32 %v141_v37, %v82_v27  ;;  %1087 = vmatprep.subr.bf16.mxu0 %v1086_v33  ;;  %v297_v41 = vmul.f32 %v140_v36, %v83_v29  ;;  %v95_v27 = vld [vmem:[#allocation6 + $0x98] sm:$0xff]  ;;  %v96_v29 = vld [vmem:[#allocation6 + $0xa0] sm:$0xff]  ;;  %v98_v33 = vld [vmem:[#allocation6 + $0xb0] sm:$0xff]  ;;  %v307_v36 = vmul.f32 %v93_v26, %v1396_v3 }
  0xb8   :  { %v309_v37 = vmul.f32 %v95_v27, %v1394_v2  ;;  %v111_v27 = vld [vmem:[#allocation6 + $0x118] sm:$0xff] }
  0xb9   :  { %v151_v42 = vpop.permute.xlu1 %150  ;;  %v149_v43 = vpop.permute.xlu0 %148  ;;  %v1088_v44 = vpack.c.bf16 %v294_v38, %v290_v30  ;;  %v1102_v45 = vpack.c.bf16 %v297_v41, %v293_v40  ;;  %v1104_v46 = vpack.c.bf16 %v296_v39, %v292_v34  ;;  %v306_v38 = vmul.f32 %v92_v25, %v1388_v1 }
  0xba   :  { %v159_v50 = vsel %vm156_vm2, %v149_v43, %v151_v42  ;;  %v308_v39 = vmul.f32 %v94_v28, %v1386_v0  ;;  %v109_v28 = vld [vmem:[#allocation6 + $0x108] sm:$0xff] }
  0xbb   :  { %1089 = vmatpush1.bf16.msra.mxu0 %v1088_v44  ;;  %1103 = vmatprep.subr.bf16.mxu1 %v1102_v45  ;;  %v299_v57 = vmul.f32 %v159_v50, %v85_v49 }
  0xbc   :  { %1105 = vmatpush1.bf16.msra.mxu1 %v1104_v46 }
  0xbd   :  { %v155_v47 = vpop.permute.xlu1 %154  ;;  %v153_v48 = vpop.permute.xlu0 %152 }
  0xbe   :  { %v160_v55 = vsel %vm156_vm2, %v155_v47, %v149_v43  ;;  %v158_v60 = vsel %vm156_vm2, %v151_v42, %v153_v48  ;;  %v157_v62 = vsel %vm156_vm2, %v153_v48, %v155_v47 }
  0xbf   :  { %v298_v7 = vmul.f32 %v160_v55, %v84_v54  ;;  %v300_v12 = vmul.f32 %v158_v60, %v86_v58  ;;  %v301_v16 = vmul.f32 %v157_v62, %v87_v59  ;;  %v101_v55 = vld [vmem:[#allocation6 + $0xc8] sm:$0xff]  ;;  %v104_v58 = vld [vmem:[#allocation6 + $0xe0] sm:$0xff] }
  0xc0   :  { %v105_v62 = vld [vmem:[#allocation6 + $0xe8] sm:$0xff] }
  0xc1   :  { %v168_v52 = vpop.permute.xlu1 %167  ;;  %v166_v53 = vpop.permute.xlu0 %165 }
  0xc2   :  { %v176_v56 = vsel %vm173_vm3, %v166_v53, %v168_v52 }
  0xc3   :  { %v303_v61 = vmul.f32 %v176_v56, %v89_v51 }
  0xc5   :  { %v172_v8 = vpop.permute.xlu1 %171  ;;  %v170_v9 = vpop.permute.xlu0 %169  ;;  %v1090_v11 = vpack.c.bf16 %v303_v61, %v299_v57  ;;  %v102_v57 = vld [vmem:[#allocation6 + $0xd0] sm:$0xff]  ;;  %v107_v61 = vld [vmem:[#allocation6 + $0xf8] sm:$0xff] }
  0xc6   :  { %v177_v13 = vsel %vm173_vm3, %v172_v8, %v166_v53  ;;  %v174_v14 = vsel %vm173_vm3, %v170_v9, %v172_v8  ;;  %v175_v15 = vsel %vm173_vm3, %v168_v52, %v170_v9  ;;  %v103_v53 = vld [vmem:[#allocation6 + $0xd8] sm:$0xff] }
  0xc7   :  { %v302_v17 = vmul.f32 %v177_v13, %v88_v63  ;;  %v304_v18 = vmul.f32 %v175_v15, %v90_v5  ;;  %v305_v19 = vmul.f32 %v174_v14, %v91_v6  ;;  %1091 = vmatprep.subr.bf16.mxu0 %v1090_v11  ;;  %v106_v63 = vld [vmem:[#allocation6 + $0xf0] sm:$0xff]  ;;  %v100_v5 = vld [vmem:[#allocation6 + $0xc0] sm:$0xff] }
  0xc9   :  { %v189_v20 = vpop.permute.xlu1 %188  ;;  %v187_v21 = vpop.permute.xlu0 %186  ;;  %v1092_v22 = vpack.c.bf16 %v302_v17, %v298_v7  ;;  %v1106_v23 = vpack.c.bf16 %v305_v19, %v301_v16  ;;  %v1108_v24 = vpack.c.bf16 %v304_v18, %v300_v12 }
  0xca   :  { %v197_v30 = vsel %vm194_vm4, %v187_v21, %v189_v20 }
  0xcb   :  { %1093 = vmatpush1.bf16.msra.mxu0 %v1092_v22  ;;  %1107 = vmatprep.subr.bf16.mxu1 %v1106_v23  ;;  %v310_v40 = vmul.f32 %v197_v30, %v96_v29  ;;  %v110_v29 = vld [vmem:[#allocation6 + $0x110] sm:$0xff]  ;;  %v108_v30 = vld [vmem:[#allocation6 + $0x100] sm:$0xff] }
  0xcc   :  { %1109 = vmatpush1.bf16.msra.mxu1 %v1108_v24 }
  0xcd   :  { %v193_v34 = vpop.permute.xlu1 %192  ;;  %v191_v35 = vpop.permute.xlu0 %190  ;;  %v1096_v49 = vpack.c.bf16 %v310_v40, %v306_v38 }
  0xce   :  { %v198_v41 = vsel %vm194_vm4, %v193_v34, %v187_v21  ;;  %v195_v42 = vsel %vm194_vm4, %v191_v35, %v193_v34  ;;  %v196_v43 = vsel %vm194_vm4, %v189_v20, %v191_v35 }
  0xcf   :  { %v313_v44 = vmul.f32 %v198_v41, %v99_v31  ;;  %v311_v45 = vmul.f32 %v196_v43, %v97_v32  ;;  %v312_v46 = vmul.f32 %v195_v42, %v98_v33  ;;  %v326_v41 = vld [vmem:[%s1719_s3] sm:$0xff] }
  0xd1   :  { %v206_v3 = vpop.permute.xlu1 %205  ;;  %v204_v47 = vpop.permute.xlu0 %203  ;;  %v1094_v2 = vpack.c.bf16 %v311_v45, %v307_v36  ;;  %v1110_v48 = vpack.c.bf16 %v313_v44, %v309_v37  ;;  %v1112_v1 = vpack.c.bf16 %v312_v46, %v308_v39 }
  0xd2   :  { %v214_v6 = vsel %vm211_vm6, %v204_v47, %v206_v3 }
  0xd3   :  { %1095 = vmatprep.subr.bf16.mxu0 %v1094_v2  ;;  %1111 = vmatprep.subr.bf16.mxu1 %v1110_v48  ;;  %v314_v20 = vmul.f32 %v214_v6, %v100_v5  ;;  %v483_v6 = vld [vmem:[#allocation8] sm:$0xff] }
  0xd4   :  { %1097 = vmatpush1.bf16.msra.mxu0 %v1096_v49  ;;  %1113 = vmatpush1.bf16.msra.mxu1 %v1112_v1 }
  0xd5   :  { %v210_v0 = vpop.permute.xlu1 %209  ;;  %v208_v50 = vpop.permute.xlu0 %207 }
  0xd6   :  { %v215_v54 = vsel %vm211_vm6, %v210_v0, %v204_v47  ;;  %v213_v56 = vsel %vm211_vm6, %v206_v3, %v208_v50  ;;  %v212_v60 = vsel %vm211_vm6, %v208_v50, %v210_v0 }
  0xd7   :  { %v317_v7 = vmul.f32 %v215_v54, %v103_v53  ;;  %v315_v8 = vmul.f32 %v213_v56, %v101_v55  ;;  %v316_v16 = vmul.f32 %v212_v60, %v102_v57  ;;  %v488_v60 = vld [vmem:[#allocation8 + $0x28] sm:$0xff] }
  0xd9   :  { %v223_v51 = vpop.permute.xlu1 %222  ;;  %v221_v52 = vpop.permute.xlu0 %220 }
  0xda   :  { %v231_v59 = vsel %vm228_vm5, %v221_v52, %v223_v51 }
  0xdb   :  { %v318_v12 = vmul.f32 %v231_v59, %v104_v58  ;;  %v484_v58 = vld [vmem:[#allocation8 + $0x8] sm:$0xff] }
  0xdd   :  { %v227_v9 = vpop.permute.xlu1 %226  ;;  %v225_v11 = vpop.permute.xlu0 %224  ;;  %v1100_v26 = vpack.c.bf16 %v318_v12, %v314_v20 }
  0xde   :  { %v232_v13 = vsel %vm228_vm5, %v227_v9, %v221_v52  ;;  %v229_v14 = vsel %vm228_vm5, %v225_v11, %v227_v9  ;;  %v230_v15 = vsel %vm228_vm5, %v223_v51, %v225_v11  ;;  %v724_v51 = vld [vmem:[%s1722_s6] sm:$0xff]  ;;  %v486_v11 = vld [vmem:[#allocation8 + $0x18] sm:$0xff] }
  0xdf   :  { %v321_v17 = vmul.f32 %v232_v13, %v107_v61  ;;  %v319_v18 = vmul.f32 %v230_v15, %v105_v62  ;;  %v320_v19 = vmul.f32 %v229_v14, %v106_v63  ;;  %v487_v14 = vld [vmem:[#allocation8 + $0x20] sm:$0xff]  ;;  %v490_v15 = vld [vmem:[#allocation8 + $0x38] sm:$0xff] }
  0xe1   :  { %v240_v21 = vpop.permute.xlu1 %239  ;;  %v238_v22 = vpop.permute.xlu0 %237  ;;  %v1098_v23 = vpack.c.bf16 %v319_v18, %v315_v8  ;;  %v1114_v24 = vpack.c.bf16 %v321_v17, %v317_v7  ;;  %v1116_v25 = vpack.c.bf16 %v320_v19, %v316_v16  ;;  %v489_v7 = vld [vmem:[#allocation8 + $0x30] sm:$0xff] }
  0xe2   :  { %v248_v31 = vsel %vm245_vm7, %v238_v22, %v240_v21  ;;  %v485_v16 = vld [vmem:[#allocation8 + $0x10] sm:$0xff] }
  0xe3   :  { %1099 = vmatprep.subr.bf16.mxu0 %v1098_v23  ;;  %1115 = vmatprep.subr.bf16.mxu1 %v1114_v24  ;;  %v322_v40 = vmul.f32 %v248_v31, %v108_v30 }
  0xe4   :  { %1101 = vmatpush1.bf16.msra.mxu0 %v1100_v26  ;;  %1117 = vmatpush1.bf16.msra.mxu1 %v1116_v25 }
  0xe5   :  { %v244_v32 = vpop.permute.xlu1 %243  ;;  %v242_v33 = vpop.permute.xlu0 %241 }
  0xe6   :  { %v249_v34 = vsel %vm245_vm7, %v244_v32, %v238_v22  ;;  %v246_v35 = vsel %vm245_vm7, %v242_v33, %v244_v32  ;;  %v247_v36 = vsel %vm245_vm7, %v240_v21, %v242_v33 }
  0xe7   :  { %v325_v37 = vmul.f32 %v249_v34, %v111_v27  ;;  %v323_v38 = vmul.f32 %v247_v36, %v109_v28  ;;  %v324_v39 = vmul.f32 %v246_v35, %v110_v29  ;;  %v492_v36 = vld [vmem:[#allocation8 + $0x48] sm:$0xff] }
  0xe9   :  { %353 = vmatprep.subr.mxu0 %v323_v38  ;;  %424 = vmatprep.subr.mxu1 %v325_v37  ;;  %v496_v38 = vld [vmem:[#allocation8 + $0x68] sm:$0xff] }
  0xea   :  { %354 = vmatpush1.msra.mxu0 %v322_v40  ;;  %425 = vmatpush1.msra.mxu1 %v324_v39 }
  0xeb   :  { %1076 = vmatmul.mubr.msk.f32.vlgmr.msra.gmra.mrb[0].mxu0 %vm333_vm8, %v326_v41  ;;  %1077 = vmatmul.mubr.msk.f32.vlgmr.msra.gmra.mrb[0].mxu1 %vm333_vm8, %v326_v41 }
  0xec   :  { %797 = vmatprep.mubr.f32.mxu0 %v1290_v4  ;;  %868 = vmatprep.mubr.f32.mxu1 %v1290_v4 }
  0xf6   :  { %v331_v42 = vpop.permute.xlu0 %330 }
 0x1be   :  { %v474_v43 = vpop.f32.mrb[0].mxu1  ;;  %v403_v44 = vpop.f32.mrb[0].mxu0 }
 0x1bf   :  { %v475_v45 = vadd.f32 %v474_v43, %v331_v42  ;;  %v404_v46 = vadd.f32 %v403_v44, %v331_v42  ;;  %v405_v3 = vpop.f32.mrb[1].mxu0  ;;  %v476_v47 = vpop.f32.mrb[1].mxu1  ;;  %v491_v43 = vld [vmem:[#allocation8 + $0x40] sm:$0xff]  ;;  %v497_v44 = vld [vmem:[#allocation8 + $0x70] sm:$0xff] }
 0x1c0   :  { %v406_v1 = vadd.f32 %v405_v3, %v331_v42  ;;  %v477_v0 = vadd.f32 %v476_v47, %v331_v42  ;;  %v494_v3 = vld [vmem:[#allocation8 + $0x58] sm:$0xff] }
 0x1c1   :  { %v1548_v2 = vmax.f32 %v475_v45, 0.0  ;;  %v1550_v48 = vmax.f32 %v404_v46, 0.0 }
 0x1c2   :  { %v1556_v49 = vmax.f32 %v406_v1, 0.0  ;;  %v1562_v50 = vmax.f32 %v477_v0, 0.0  ;;  %v495_v0 = vld [vmem:[#allocation8 + $0x60] sm:$0xff] }
 0x1c3   :  { %523 = vrot.lane.b32.xlu0 %v1548_v2, %s1283_s27  ;;  %519 = vrot.lane.b32.xlu1 %v1550_v48, %s1283_s27 }
 0x1c7   :  { %535 = vrot.lane.b32.xlu0 %v1550_v48, %s1284_s2  ;;  %521 = vrot.lane.b32.xlu1 %v1556_v49, %s1283_s27 }
 0x1cb   :  { %539 = vrot.lane.b32.xlu0 %v1548_v2, %s1284_s2  ;;  %525 = vrot.lane.b32.xlu1 %v1562_v50, %s1283_s27 }
 0x1cf   :  { %551 = vrot.lane.b32.xlu0 %v1550_v48, %s1285_s19  ;;  %537 = vrot.lane.b32.xlu1 %v1556_v49, %s1284_s2 }
 0x1d3   :  { %555 = vrot.lane.b32.xlu0 %v1548_v2, %s1285_s19  ;;  %541 = vrot.lane.b32.xlu1 %v1562_v50, %s1284_s2 }
 0x1d7   :  { %567 = vrot.lane.b32.xlu0 %v1550_v48, %s1286_s20  ;;  %553 = vrot.lane.b32.xlu1 %v1556_v49, %s1285_s19 }
 0x1db   :  { %571 = vrot.lane.b32.xlu0 %v1548_v2, %s1286_s20  ;;  %557 = vrot.lane.b32.xlu1 %v1562_v50, %s1285_s19 }
 0x1df   :  { %587 = vrot.lane.b32.xlu0 %v1550_v48, %s1287_s26  ;;  %569 = vrot.lane.b32.xlu1 %v1556_v49, %s1286_s20 }
 0x1e3   :  { %591 = vrot.lane.b32.xlu0 %v1548_v2, %s1287_s26  ;;  %573 = vrot.lane.b32.xlu1 %v1562_v50, %s1286_s20 }
 0x1e7   :  { %603 = vrot.lane.b32.xlu0 %v1550_v48, %s1288_s28  ;;  %589 = vrot.lane.b32.xlu1 %v1556_v49, %s1287_s26 }
 0x1eb   :  { %607 = vrot.lane.b32.xlu0 %v1548_v2, %s1288_s28  ;;  %593 = vrot.lane.b32.xlu1 %v1562_v50, %s1287_s26 }
 0x1ef   :  { %619 = vrot.lane.b32.xlu0 %v1550_v48, %s1289_s29  ;;  %605 = vrot.lane.b32.xlu1 %v1556_v49, %s1288_s28 }
 0x1f3   :  { %623 = vrot.lane.b32.xlu0 %v1548_v2, %s1289_s29  ;;  %609 = vrot.lane.b32.xlu1 %v1562_v50, %s1288_s28 }
 0x1f7   :  { %635 = vrot.lane.b32.xlu0 %v1550_v48, %s1292_s30  ;;  %621 = vrot.lane.b32.xlu1 %v1556_v49, %s1289_s29 }
 0x1fb   :  { %639 = vrot.lane.b32.xlu0 %v1548_v2, %s1292_s30  ;;  %625 = vrot.lane.b32.xlu1 %v1562_v50, %s1289_s29 }
 0x1ff   :  { %727 = vperm.xlu0 %1166, %v724_v51   ;;  %637 = vrot.lane.b32.xlu1 %v1556_v49, %s1292_s30  ;;  %v498_v51 = vld [vmem:[#allocation8 + $0x78] sm:$0xff] }
 0x203   :  { %641 = vrot.lane.b32.xlu1 %v1562_v50, %s1292_s30 }
 0x235   :  { %v524_v52 = vpop.permute.xlu0 %523  ;;  %v520_v53 = vpop.permute.xlu1 %519 }
 0x239   :  { %v536_v54 = vpop.permute.xlu0 %535  ;;  %v522_v55 = vpop.permute.xlu1 %521 }
 0x23a   :  { %v529_v59 = vsel %vm122_vm0, %v520_v53, %v522_v55  ;;  %v528_v17 = vsel %vm122_vm0, %v522_v55, %v524_v52 }
 0x23b   :  { %v688_v5 = vmul.f32 %v529_v59, %v484_v58  ;;  %v689_v28 = vmul.f32 %v528_v17, %v485_v16 }
 0x23d   :  { %v540_v56 = vpop.permute.xlu0 %539  ;;  %v526_v57 = vpop.permute.xlu1 %525 }
 0x23e   :  { %v527_v12 = vsel %vm122_vm0, %v524_v52, %v526_v57  ;;  %v530_v13 = vsel %vm122_vm0, %v526_v57, %v520_v53  ;;  %v493_v52 = vld [vmem:[#allocation8 + $0x50] sm:$0xff] }
 0x23f   :  { %v687_v24 = vmul.f32 %v530_v13, %v483_v6  ;;  %v690_v25 = vmul.f32 %v527_v12, %v486_v11 }
 0x241   :  { %v552_v61 = vpop.permute.xlu0 %551  ;;  %v538_v62 = vpop.permute.xlu1 %537 }
 0x242   :  { %v545_v63 = vsel %vm139_vm1, %v536_v54, %v538_v62  ;;  %v544_v8 = vsel %vm139_vm1, %v538_v62, %v540_v56 }
 0x243   :  { %v692_v9 = vmul.f32 %v545_v63, %v488_v60  ;;  %v693_v21 = vmul.f32 %v544_v8, %v489_v7  ;;  %v503_v7 = vld [vmem:[#allocation8 + $0xa0] sm:$0xff]  ;;  %v504_v8 = vld [vmem:[#allocation8 + $0xa8] sm:$0xff] }
 0x245   :  { %v556_v18 = vpop.permute.xlu0 %555  ;;  %v542_v19 = vpop.permute.xlu1 %541  ;;  %v1118_v20 = vpack.c.bf16 %v692_v9, %v688_v5  ;;  %v1136_v33 = vpack.c.bf16 %v693_v21, %v689_v28  ;;  %v499_v5 = vld [vmem:[#allocation8 + $0x80] sm:$0xff]  ;;  %v500_v9 = vld [vmem:[#allocation8 + $0x88] sm:$0xff]  ;;  %v501_v21 = vld [vmem:[#allocation8 + $0x90] sm:$0xff] }
 0x246   :  { %v543_v22 = vsel %vm139_vm1, %v540_v56, %v542_v19  ;;  %v546_v23 = vsel %vm139_vm1, %v542_v19, %v536_v54 }
 0x247   :  { %v691_v26 = vmul.f32 %v546_v23, %v487_v14  ;;  %v694_v27 = vmul.f32 %v543_v22, %v490_v15  ;;  %1119 = vmatprep.subr.bf16.mxu0 %v1118_v20  ;;  %v704_v22 = vmul.f32 %v500_v9, %v1556_v49  ;;  %v505_v23 = vld [vmem:[#allocation8 + $0xb0] sm:$0xff]  ;;  %v516_v9 = vld [vmem:[#allocation8 + $0x108] sm:$0xff] }
 0x249   :  { %v1120_v29 = vpack.c.bf16 %v691_v26, %v687_v24  ;;  %v568_v30 = vpop.permute.xlu0 %567  ;;  %v554_v31 = vpop.permute.xlu1 %553  ;;  %v1134_v32 = vpack.c.bf16 %v694_v27, %v690_v25  ;;  %v506_v24 = vld [vmem:[#allocation8 + $0xb8] sm:$0xff] }
 0x24a   :  { %v561_v37 = vsel %vm156_vm2, %v552_v61, %v554_v31  ;;  %v560_v53 = vsel %vm156_vm2, %v554_v31, %v556_v18  ;;  %v502_v25 = vld [vmem:[#allocation8 + $0x98] sm:$0xff]  ;;  %v705_v31 = vmul.f32 %v501_v21, %v1548_v2  ;;  %v723_v21 = vld [vmem:[%s1721_s5] sm:$0xff] }
 0x24b   :  { %1121 = vmatpush1.bf16.msra.mxu0 %v1120_v29  ;;  %1135 = vmatprep.subr.bf16.mxu1 %v1134_v32  ;;  %v696_v42 = vmul.f32 %v561_v37, %v492_v36  ;;  %v697_v6 = vmul.f32 %v560_v53, %v493_v52  ;;  %v706_v49 = vmul.f32 %v502_v25, %v1562_v50  ;;  %v510_v53 = vld [vmem:[#allocation8 + $0xd8] sm:$0xff] }
 0x24c   :  { %1137 = vmatpush1.bf16.msra.mxu1 %v1136_v33 }
 0x24d   :  { %v572_v34 = vpop.permute.xlu0 %571  ;;  %v558_v35 = vpop.permute.xlu1 %557 }
 0x24e   :  { %v559_v47 = vsel %vm156_vm2, %v556_v18, %v558_v35  ;;  %v562_v1 = vsel %vm156_vm2, %v558_v35, %v552_v61  ;;  %v703_v18 = vmul.f32 %v499_v5, %v1550_v48 }
 0x24f   :  { %v695_v60 = vmul.f32 %v562_v1, %v491_v43  ;;  %v698_v62 = vmul.f32 %v559_v47, %v494_v3  ;;  %v511_v43 = vld [vmem:[#allocation8 + $0xe0] sm:$0xff]  ;;  %v509_v1 = vld [vmem:[#allocation8 + $0xd0] sm:$0xff] }
 0x251   :  { %v588_v39 = vpop.permute.xlu0 %587  ;;  %v570_v40 = vpop.permute.xlu1 %569 }
 0x252   :  { %v577_v41 = vsel %vm173_vm3, %v568_v30, %v570_v40  ;;  %v576_v45 = vsel %vm173_vm3, %v570_v40, %v572_v34 }
 0x253   :  { %v700_v46 = vmul.f32 %v577_v41, %v496_v38  ;;  %v701_v57 = vmul.f32 %v576_v45, %v497_v44  ;;  %v507_v41 = vld [vmem:[#allocation8 + $0xc0] sm:$0xff]  ;;  %v512_v44 = vld [vmem:[#allocation8 + $0xe8] sm:$0xff] }
 0x255   :  { %v592_v54 = vpop.permute.xlu0 %591  ;;  %v574_v55 = vpop.permute.xlu1 %573  ;;  %v1122_v56 = vpack.c.bf16 %v700_v46, %v696_v42  ;;  %v1140_v15 = vpack.c.bf16 %v701_v57, %v697_v6  ;;  %v508_v42 = vld [vmem:[#allocation8 + $0xc8] sm:$0xff]  ;;  %v514_v57 = vld [vmem:[#allocation8 + $0xf8] sm:$0xff] }
 0x256   :  { %v575_v58 = vsel %vm173_vm3, %v572_v34, %v574_v55  ;;  %v578_v59 = vsel %vm173_vm3, %v574_v55, %v568_v30 }
 0x257   :  { %v699_v63 = vmul.f32 %v578_v59, %v495_v0  ;;  %v702_v61 = vmul.f32 %v575_v58, %v498_v51  ;;  %1123 = vmatprep.subr.bf16.mxu0 %v1122_v56  ;;  %v513_v56 = vld [vmem:[#allocation8 + $0xf0] sm:$0xff] }
 0x259   :  { %v1124_v11 = vpack.c.bf16 %v699_v63, %v695_v60  ;;  %v604_v12 = vpop.permute.xlu0 %603  ;;  %v590_v13 = vpop.permute.xlu1 %589  ;;  %v1138_v14 = vpack.c.bf16 %v702_v61, %v698_v62 }
 0x25a   :  { %v596_v16 = vsel %vm194_vm4, %v590_v13, %v592_v54  ;;  %v597_v17 = vsel %vm194_vm4, %v588_v39, %v590_v13 }
 0x25b   :  { %v707_v19 = vmul.f32 %v597_v17, %v503_v7  ;;  %v708_v20 = vmul.f32 %v596_v16, %v504_v8  ;;  %1125 = vmatpush1.bf16.msra.mxu0 %v1124_v11  ;;  %1139 = vmatprep.subr.bf16.mxu1 %v1138_v14  ;;  %v515_v8 = vld [vmem:[#allocation8 + $0x100] sm:$0xff] }
 0x25c   :  { %1141 = vmatpush1.bf16.msra.mxu1 %v1140_v15 }
 0x25d   :  { %v1128_v26 = vpack.c.bf16 %v707_v19, %v703_v18  ;;  %v608_v27 = vpop.permute.xlu0 %607  ;;  %v594_v28 = vpop.permute.xlu1 %593  ;;  %v1126_v29 = vpack.c.bf16 %v708_v20, %v704_v22  ;;  %v517_v19 = vld [vmem:[#allocation8 + $0x110] sm:$0xff]  ;;  %v518_v20 = vld [vmem:[#allocation8 + $0x118] sm:$0xff] }
 0x25e   :  { %v595_v30 = vsel %vm194_vm4, %v592_v54, %v594_v28  ;;  %v598_v48 = vsel %vm194_vm4, %v594_v28, %v588_v39 }
 0x25f   :  { %v709_v32 = vmul.f32 %v595_v30, %v505_v23  ;;  %v710_v33 = vmul.f32 %v598_v48, %v506_v24  ;;  %1127 = vmatprep.subr.bf16.mxu0 %v1126_v29 }
 0x260   :  { %1129 = vmatpush1.bf16.msra.mxu0 %v1128_v26 }
 0x261   :  { %v1144_v34 = vpack.c.bf16 %v709_v32, %v705_v31  ;;  %v620_v35 = vpop.permute.xlu0 %619  ;;  %v606_v36 = vpop.permute.xlu1 %605  ;;  %v1142_v37 = vpack.c.bf16 %v710_v33, %v706_v49 }
 0x262   :  { %v612_v39 = vsel %vm211_vm6, %v606_v36, %v608_v27  ;;  %v613_v2 = vsel %vm211_vm6, %v604_v12, %v606_v36 }
 0x263   :  { %1143 = vmatprep.subr.bf16.mxu1 %v1142_v37  ;;  %v711_v3 = vmul.f32 %v613_v2, %v507_v41  ;;  %v712_v47 = vmul.f32 %v612_v39, %v508_v42 }
 0x264   :  { %1145 = vmatpush1.bf16.msra.mxu1 %v1144_v34 }
 0x265   :  { %v624_v38 = vpop.permute.xlu0 %623  ;;  %v610_v40 = vpop.permute.xlu1 %609 }
 0x266   :  { %v611_v54 = vsel %vm211_vm6, %v608_v27, %v610_v40  ;;  %v614_v55 = vsel %vm211_vm6, %v610_v40, %v604_v12  ;;  %v880_v27 = vld [vmem:[%s1724_s8] sm:$0xff] }
 0x267   :  { %v713_v61 = vmul.f32 %v611_v54, %v509_v1  ;;  %v714_v5 = vmul.f32 %v614_v55, %v510_v53  ;;  %883 = vperm.xlu1 %1167, %v880_v27  }
 0x269   :  { %v622_v50 = vpop.permute.xlu1 %621  ;;  %v636_v0 = vpop.permute.xlu0 %635 }
 0x26a   :  { %v628_v45 = vsel %vm228_vm5, %v622_v50, %v624_v38  ;;  %v629_v46 = vsel %vm228_vm5, %v620_v35, %v622_v50 }
 0x26b   :  { %v715_v51 = vmul.f32 %v629_v46, %v511_v43  ;;  %v716_v52 = vmul.f32 %v628_v45, %v512_v44 }
 0x26d   :  { %v1132_v58 = vpack.c.bf16 %v715_v51, %v711_v3  ;;  %v626_v59 = vpop.permute.xlu1 %625  ;;  %v1130_v60 = vpack.c.bf16 %v716_v52, %v712_v47  ;;  %v640_v11 = vpop.permute.xlu0 %639 }
 0x26e   :  { %v627_v62 = vsel %vm228_vm5, %v624_v38, %v626_v59  ;;  %v630_v63 = vsel %vm228_vm5, %v626_v59, %v620_v35  ;;  %v879_v35 = vld [vmem:[%s1723_s7] sm:$0xff]  ;;  %s1293_s7 = smov [#allocation9]  }
 0x26f   :  { %v717_v6 = vmul.f32 %v627_v62, %v513_v56  ;;  %v718_v7 = vmul.f32 %v630_v63, %v514_v57  ;;  %1131 = vmatprep.subr.bf16.mxu0 %v1130_v60  ;;  %s1066_s8 = sshll.u32 %s1293_s7, 4  ;;  %s1067_s8 = int_to_ptr.vmem [resolvable:$true] %s1066_s8 }
 0x270   :  { %1133 = vmatpush1.bf16.msra.mxu0 %v1132_v58  ;;  %s1250_s17 = scalar_lea.vmem %s1067_s8, 512  ;;  %p1255_p11 = scmp.lt.s32.totalorder %s1067_s8, %s1067_s8 }
 0x271   :  { %v1148_v12 = vpack.c.bf16 %v717_v6, %v713_v61  ;;  %v638_v13 = vpop.permute.xlu1 %637  ;;  %v1146_v14 = vpack.c.bf16 %v718_v7, %v714_v5  ;;  %p1251_p10 = scmp.ne.s32.totalorder %s1067_s8, %s1250_s17  ;;  %p1256_p12 = scmp.lt.s32.totalorder %s1250_s17, %s1250_s17 }
 0x272   :  { %v644_v15 = vsel %vm245_vm7, %v638_v13, %v640_v11  ;;  %v645_v16 = vsel %vm245_vm7, %v636_v0, %v638_v13 }
 0x273   :  { %v719_v17 = vmul.f32 %v645_v16, %v515_v8  ;;  %v720_v18 = vmul.f32 %v644_v15, %v516_v9  ;;  %1147 = vmatprep.subr.bf16.mxu1 %v1146_v14  ;;  %p1257_p13 = por %p1256_p12, %p1255_p11 }
 0x274   :  { %1149 = vmatpush1.bf16.msra.mxu1 %v1148_v12 }
 0x275   :  { %v642_v22 = vpop.permute.xlu1 %641  ;;  %749 = vmatprep.subr.mxu0 %v720_v18  ;;  %p1258_p0 = pnand %p1257_p13, %p1251_p10 }
 0x276   :  { %v643_v23 = vsel %vm245_vm7, %v640_v11, %v642_v22  ;;  %v646_v24 = vsel %vm245_vm7, %v642_v22, %v636_v0  ;;  %750 = vmatpush1.msra.mxu0 %v719_v17 }
 0x277   :  { %v721_v25 = vmul.f32 %v643_v23, %v517_v19  ;;  %v722_v26 = vmul.f32 %v646_v24, %v518_v20  ;;  %1078 = vmatmul.mubr.msk.f32.vlgmr.msra.gmra.mrb[2].mxu0 %vm333_vm8, %v723_v21 }
 0x278   :  { %954 = vmatprep.mubr.f32.mxu0 %v1290_v4 }
 0x279   :  { %820 = vmatprep.subr.mxu1 %v722_v26 }
 0x27a   :  { %821 = vmatpush1.msra.mxu1 %v721_v25 }
 0x27b   :  { %1079 = vmatmul.mubr.msk.f32.vlgmr.msra.gmra.mrb[2].mxu1 %vm333_vm8, %v723_v21 }
 0x27c   :  { %1025 = vmatprep.mubr.f32.mxu1 %v1290_v4 }
 0x27e   :  { %v728_v10 = vpop.permute.xlu0 %727 }
 0x2e6   :  { %v884_v38 = vpop.permute.xlu1 %883 }
 0x34a   :  { %v799_v28 = vpop.f32.mrb[2].mxu0 }
 0x34b   :  { %v800_v29 = vadd.f32 %v799_v28, %v728_v10  ;;  %v801_v30 = vpop.f32.mrb[3].mxu0 }
 0x34c   :  { %v802_v48 = vadd.f32 %v801_v30, %v728_v10 }
 0x34d   :  { %v875_v33 = vmax.f32 %v800_v29, 0.0 }
 0x34e   :  { %v876_v31 = vmax.f32 %v802_v48, 0.0  ;;  %v870_v32 = vpop.f32.mrb[2].mxu1 }
 0x34f   :  { %v871_v49 = vadd.f32 %v870_v32, %v728_v10  ;;  %v872_v34 = vpop.f32.mrb[3].mxu1 }
 0x350   :  { %v873_v4 = vadd.f32 %v872_v34, %v728_v10  ;;  %890 = vmatprep.subr.mxu0 %v876_v31 }
 0x351   :  { %891 = vmatpush1.msra.mxu0 %v875_v33  ;;  %v877_v37 = vmax.f32 %v871_v49, 0.0 }
 0x352   :  { %v878_v36 = vmax.f32 %v873_v4, 0.0  ;;  %1080 = vmatmul.mubr.msk.f32.vlgmr.msra.gmra.mrb[4].mxu0 %vm886_vm9, %v879_v35 }
 0x354   :  { %961 = vmatprep.subr.mxu1 %v878_v36 }
 0x355   :  { %962 = vmatpush1.msra.mxu1 %v877_v37 }
 0x356   :  { %1081 = vmatmul.mubr.msk.f32.vlgmr.msra.gmra.mrb[4].mxu1 %vm886_vm9, %v879_v35 }
 0x425   :  { %v956_v40 = vpop.f32.mrb[4].mxu0 }
 0x426   :  { %v957_v41 = vadd.f32 %v956_v40, %v884_v38  ;;  %v958_v42 = vpop.f32.mrb[5].mxu0 }
 0x427   :  { %v959_v39 = vadd.f32 %v958_v42, %v884_v38 }
 0x428   :  { %v1082_v2 = vmul.f32 -1.442695, %v957_v41 }
 0x429   :  { %v1027_v43 = vpop.f32.mrb[4].mxu1  ;;  %v1083_v44 = vmul.f32 -1.442695, %v959_v39 }
 0x42a   :  { %v1029_v50 = vpop.f32.mrb[5].mxu1  ;;  %v1028_v45 = vadd.f32 %v1027_v43, %v884_v38  ;;  %1168 = vpow2.f32 %v1082_v2 }
 0x42b   :  { %v1030_v46 = vadd.f32 %v1029_v50, %v884_v38  ;;  %1170 = vpow2.f32 %v1083_v44 }
 0x42c   :  { %v1084_v3 = vmul.f32 -1.442695, %v1028_v45 }
 0x42d   :  { %v1085_v47 = vmul.f32 -1.442695, %v1030_v46 }
 0x42e   :  { %1172 = vpow2.f32 %v1084_v3 }
 0x42f   :  { %1174 = vpow2.f32 %v1085_v47 }
 0x434   :  { %v1169_v1 = vpop.eup %1168 }
 0x435   :  { %v1171_v0 = vpop.eup %1170  ;;  %v1044_v51 = vadd.f32 1.0, %v1169_v1 }
 0x436   :  { %v1045_v52 = vadd.f32 1.0, %v1171_v0 }
 0x437   :  { %1176 = vrcp.f32 %v1044_v51 }
 0x438   :  { %v1173_v53 = vpop.eup %1172  ;;  %1178 = vrcp.f32 %v1045_v52 }
 0x439   :  { %v1175_v54 = vpop.eup %1174  ;;  %v1046_v55 = vadd.f32 1.0, %v1173_v53 }
 0x43a   :  { %v1047_v56 = vadd.f32 1.0, %v1175_v54 }
 0x43b   :  { %1180 = vrcp.f32 %v1046_v55 }
 0x43c   :  { %1182 = vrcp.f32 %v1047_v56 }
 0x441   :  { %v1177_v57 = vpop.eup %1176 }
 0x442   :  { %v1179_v58 = vpop.eup %1178  ;;  %1056 = vst [vmem:[#allocation9] sm:$0xff] %v1177_v57 }
 0x443   :  { %1057 = vst [vmem:[#allocation9 + $0x8] sm:$0xff] %v1179_v58 }
 0x445   :  { %v1181_v59 = vpop.eup %1180 }
 0x446   :  { %v1183_v60 = vpop.eup %1182  ;;  %1058 = vst [vmem:[#allocation9 + $0x10] sm:$0xff] %v1181_v59 }
 0x447   :  { %1059 = vst [vmem:[#allocation9 + $0x18] sm:$0xff] %v1183_v60 }
 0x448   :  { %1261 = shalt.err (!%p1258_p0)
}
 0x449   :  { %s1262_s22 = scalar_lea.hbm %s1725_s9, 512 }
 0x44a   :  { %p1263_p1 = scmp.ne.s32.totalorder %s1725_s9, %s1262_s22  ;;  %p1266_p2 = scmp.lt.u32.totalorder %s1262_s22, %s1725_s9 }
 0x44c   :  { %p1268_p3 = pnand %p1266_p2, %p1263_p1 }
 0x44e   :  { %1271 = shalt.err (!%p1268_p3)
}
 0x44f   :  { %1069 = dma.vmem_to_hbm [thread:$0]  %s1067_s8, 512, %s1725_s9, [#allocation5]  }
 0x450   :  { %1276 = dma.done.wait [#allocation5], 512  }
 0x451   :  { %1277 = vsyncadd [#allocation5], 4294966784 }
 0x452   :  { %1073 = vsyncpa [#allocation4], 1 }
 0x453   :  { %1074 = vsyncpa [#allocation7], 1 }
 0x454   :  { %1075 = vsyncpa [#allocation5], 1 }

</bundles_post_ra>
